<compile_context>
chip_gen: v5e
topology: v5e:2x2
jax: 0.10.0
libtpu: 0.0.40
codegen_flags: <defaults>
</compile_context>

<pallas_src>
import functools

import jax
import jax.numpy as jnp
import numpy as np
from jax import lax
from jax.experimental import pallas as pl
from jax.experimental.pallas import tpu as pltpu


def _posenc_kernel(seed_ref, x_ref, pe_ref, o_ref, *,
                   dropout_p, train, n_rows, row_tile, width):
    # x_ref: (1, TR, W) block for this (row_tile, batch); pe_ref: (TR, W).
    y = x_ref[...] + pe_ref[...][None, :, :]

    if train and dropout_p > 0.0:
        s = pl.program_id(0).astype(jnp.uint32)   # row-tile index
        b = pl.program_id(1).astype(jnp.uint32)   # batch index
        shape = y.shape                           # (1, TR, W)
        row = lax.broadcasted_iota(jnp.int32, shape, 1).astype(jnp.uint32)
        col = lax.broadcasted_iota(jnp.int32, shape, 2).astype(jnp.uint32)
        # Unique global element index -> unique dropout decision per element.
        base = b * jnp.uint32(n_rows) + s * jnp.uint32(row_tile)
        idx = (base + row) * jnp.uint32(width) + col
        # murmur3 fmix32 of (index ^ seed*phi) — cheap, VPU-only, portable.
        h = idx ^ (seed_ref[0].astype(jnp.uint32) * jnp.uint32(0x9E3779B9))
        h = h ^ (h >> 16)
        h = h * jnp.uint32(0x85EBCA6B)
        h = h ^ (h >> 13)
        h = h * jnp.uint32(0xC2B2AE35)
        h = h ^ (h >> 16)
        thresh = jnp.uint32(min(int(round(dropout_p * (1 << 32))), (1 << 32) - 1))
        keep = h >= thresh
        scale = jnp.asarray(1.0 / (1.0 - dropout_p), dtype=y.dtype)
        zero = jnp.asarray(0.0, dtype=y.dtype)
        y = y * jnp.where(keep, scale, zero)

    o_ref[...] = y.astype(o_ref.dtype)


def make_positional_encodings(embed_dim: int, sequence_length: int) -> jnp.ndarray:
    # Parameter-free "weights": the fixed sinusoidal table, computed exactly as
    # in the module's __init__ (plain-JAX glue outside the kernel).
    positions = jnp.arange(sequence_length, dtype=jnp.float32)[:, None]          # (S, 1)
    div_term = jnp.exp(-(jnp.arange(0, embed_dim, 2, dtype=jnp.float32)
                         * np.log(10000.0) / embed_dim))                          # (ceil(D/2),)
    terms = positions * div_term                                                  # (S, ceil(D/2))
    pe = jnp.zeros((sequence_length, embed_dim), dtype=jnp.float32)
    pe = pe.at[:, 0::2].set(jnp.sin(terms))
    pe = pe.at[:, 1::2].set(jnp.cos(terms)[:, : embed_dim // 2])                  # guard odd D
    return pe                                                                     # (S, D)


def _choose_layout(S: int, D: int):
    """Pick a (rows, width) view of the per-batch (S, D) slab with a lane-dense width."""
    if D % 128 == 0:
        return S, D
    if (S * D) % 128 == 0:
        return (S * D) // 128, 128
    return S, D   # fallback: masked lane stores, still correct


def _choose_row_tile(n_rows: int, width: int, itemsize: int,
                     target_bytes: int = 2 * 1024 * 1024) -> int:
    """~2 MiB blocks: big enough for HBM roofline, small enough for v7x VMEM
    (x/pe/out double-buffered -> ~6 blocks resident -> ~12 MiB peak)."""
    rows = max(1, target_bytes // (width * itemsize))
    if rows >= n_rows:
        return n_rows
    rows = max(8, (rows // 8) * 8)
    return min(rows, n_rows)


def positional_encoding_forward(x, pe, *, dropout_p=0.1, train=False, seed=0):
    """x: (B, S, D); pe: (S_full, D). Returns (B, S, D) = dropout(x + pe[:S])."""
    B, S, D = x.shape
    pe_sliced = pe[:S, :].astype(x.dtype)   # == positional_encodings[:, :x.size(1)]

    # Lane-dense re-layout (metadata-only reshape; pe broadcast over batch is
    # preserved because the flattening stays inside the per-batch (S, D) slab).
    R, W = _choose_layout(S, D)
    x2 = x.reshape(B, R, W)
    pe2 = pe_sliced.reshape(R, W)

    itemsize = x.dtype.itemsize
    TR = _choose_row_tile(R, W, itemsize)
    grid = (pl.cdiv(R, TR), B)              # row-tiles outer, batch inner -> pe stays resident

    seed_arr = jnp.asarray([seed], dtype=jnp.int32)
    kernel = functools.partial(
        _posenc_kernel, dropout_p=float(dropout_p), train=bool(train),
        n_rows=R, row_tile=TR, width=W)

    cost = pl.CostEstimate(
        flops=B * S * D,
        transcendentals=0,
        bytes_accessed=(2 * B * S * D + S * D) * itemsize,
    )

    out = pl.pallas_call(
        kernel,
        out_shape=jax.ShapeDtypeStruct((B, R, W), x.dtype),
        grid_spec=pltpu.PrefetchScalarGridSpec(
            num_scalar_prefetch=1,
            grid=grid,
            in_specs=[
                pl.BlockSpec((1, TR, W), lambda s, b, seed: (b, s, 0)),
                pl.BlockSpec((TR, W), lambda s, b, seed: (s, 0)),
            ],
            out_specs=pl.BlockSpec((1, TR, W), lambda s, b, seed: (b, s, 0)),
        ),
        compiler_params=pltpu.CompilerParams(
            dimension_semantics=("parallel", "parallel")),  # hash PRNG is order-independent
        cost_estimate=cost,
    )(seed_arr, x2, pe2)

    return out.reshape(B, S, D)


if __name__ == "__main__":
    B, S, D = 2, 8, 32
    key = jax.random.PRNGKey(0)
    x = jax.random.normal(key, (B, S, D), dtype=jnp.float32)

    pe = make_positional_encodings(embed_dim=D, sequence_length=S)

    # Eval mode (dropout = identity): exact match against the reference math.
    y_eval = jax.block_until_ready(
        positional_encoding_forward(x, pe, dropout_p=0.1, train=False))
    ref = x + pe[None, :, :]
    np.testing.assert_allclose(np.asarray(y_eval), np.asarray(ref),
                               rtol=1e-6, atol=1e-6)

    # Train mode: in-kernel dropout. Every kept element must equal
    # (x + pe) / (1 - p); dropped elements are exactly zero.
    p = 0.1
    y_train = jax.block_until_ready(
        positional_encoding_forward(x, pe, dropout_p=p, train=True, seed=123))
    assert y_train.shape == (B, S, D)
    yt = np.asarray(y_train)
    scaled = np.asarray(ref) / (1.0 - p)
    kept = yt != 0.0
    np.testing.assert_allclose(yt[kept], scaled[kept], rtol=1e-5, atol=1e-5)

    print("KERNEL_OK")
</pallas_src>

<mosaic_0001>
module attributes {stable_mosaic.version = 11 : i64} {
  func.func @_posenc_kernel(%arg0: i32, %arg1: i32, %arg2: memref<1xi32, #tpu.memory_space<smem>>, %arg3: memref<1x2x128xf32, #tpu.memory_space<vmem>>, %arg4: memref<2x128xf32, #tpu.memory_space<vmem>>, %arg5: memref<1x2x128xf32, #tpu.memory_space<vmem>>) attributes {dimension_semantics = [#tpu.dimension_semantics<parallel>, #tpu.dimension_semantics<parallel>], iteration_bounds = array<i64: 1, 2>, scalar_prefetch = 1 : i64, scratch_operands = 0 : i64, tpu.core_type = #tpu.core_type<tc>, window_params = [{transform_indices = @transform_0, window_bounds = array<i64: 1, 2, 128>}, {transform_indices = @transform_1, window_bounds = array<i64: 2, 128>}, {transform_indices = @transform_2, window_bounds = array<i64: 1, 2, 128>}]} {
    %c0 = arith.constant 0 : index
    %c0_0 = arith.constant 0 : index
    %c0_1 = arith.constant 0 : index
    %0 = vector.load %arg3[%c0, %c0_0, %c0_1] : memref<1x2x128xf32, #tpu.memory_space<vmem>>, vector<1x2x128xf32>
    %c0_2 = arith.constant 0 : index
    %c0_3 = arith.constant 0 : index
    %1 = vector.load %arg4[%c0_2, %c0_3] : memref<2x128xf32, #tpu.memory_space<vmem>>, vector<2x128xf32>
    %2 = vector.shape_cast %1 : vector<2x128xf32> to vector<1x2x128xf32>
    %3 = arith.addf %0, %2 : vector<1x2x128xf32>
    %c0_4 = arith.constant 0 : index
    %c0_5 = arith.constant 0 : index
    %c0_6 = arith.constant 0 : index
    %4 = vector.load %arg5[%c0_4, %c0_5, %c0_6] : memref<1x2x128xf32, #tpu.memory_space<vmem>>, vector<1x2x128xf32>
    tpu.vector_store %arg5[%c0_4, %c0_5, %c0_6], %3 {strides = array<i32>} : memref<1x2x128xf32, #tpu.memory_space<vmem>>, vector<1x2x128xf32>,
    return
  }
  func.func @transform_0(%arg0: i32, %arg1: i32, %arg2: memref<1xi32, #tpu.memory_space<smem>>) -> (i32, i32, i32) {
    %c0_i32 = arith.constant 0 : i32
    %c0_i32_0 = arith.constant 0 : i32
    return %arg1, %arg0, %c0_i32 : i32, i32, i32
  }
  func.func @transform_1(%arg0: i32, %arg1: i32, %arg2: memref<1xi32, #tpu.memory_space<smem>>) -> (i32, i32) {
    %c0_i32 = arith.constant 0 : i32
    %c0_i32_0 = arith.constant 0 : i32
    return %arg0, %c0_i32 : i32, i32
  }
  func.func @transform_2(%arg0: i32, %arg1: i32, %arg2: memref<1xi32, #tpu.memory_space<smem>>) -> (i32, i32, i32) {
    %c0_i32 = arith.constant 0 : i32
    %c0_i32_0 = arith.constant 0 : i32
    return %arg1, %arg0, %c0_i32 : i32, i32, i32
  }
}

</mosaic_0001>

<bundles_post_ra>
// kernel: tpu_custom_call.1
= control target key start
LH: loop header
LB: loop body
LE: loop exit
PB: predicated region body
PF: predicated region fallthrough
CT: control target
= control target key end

     0   :  { %9 = vsyncpa [#allocation5], 0  ;;  %s646_s0 = inlined_call_operand.<no memory space> [shape: s32[1], index: 0, kind: input, shape index: {}]   ;;  %s647_s1 = inlined_call_operand.hbm [shape: f32[2,2,128], index: 1, kind: input, shape index: {}]   ;;  %s648_s2 = inlined_call_operand.vmem [shape: f32[2,128], index: 2, kind: input, shape index: {}]   ;;  %s649_s3 = inlined_call_operand.hbm [shape: f32[2,2,128], index: 3, kind: output, shape index: {}]  }
   0x1   :  { %11 = vsyncpa [#allocation5 + $0x1], 0 }
   0x2   :  { %12 = vsyncpa [#allocation6], 0 }
   0x3   :  { %14 = vsyncpa [#allocation6 + $0x1], 0  ;;  %s523_s12 = smov 0   ;;  %s525_s13 = smov 0  }
   0x4   :  { %s527_s14 = smov 0   ;;  %s529_s0 = smov 0  }
   0x5   :  { %s531_s15 = smov 0   ;;  %s533_s16 = smov 0  }
   0x6 LB: > { %s313_s17 = sadd.s32 4294967295, %s501_s16   ;;  %s314_s18 = sadd.s32 4294967294, %s501_s16   ;;  %s501_s16 = sphi %s533_s16, %s20_s16   ;;  %s497_s15 = sphi %s531_s15, %s658_s15   ;;  %s493_s0 = sphi %s529_s0, %s657_s0   ;;  %s489_s14 = sphi %s527_s14, %s656_s14   ;;  %s485_s13 = sphi %s525_s13, %s655_s13   ;;  %s481_s12 = sphi %s523_s12, %s654_s12  }
   0x7   : > { %s29_s19 = sadd.s32 1, %s497_s15  ;;  %s41_s20 = sadd.s32 1, %s489_s14 }
   0x8   : > { %p30_p0 = scmp.ge.s32.totalorder %s29_s19, 2  ;;  %p48_p1 = scmp.ne.s32.totalorder %s489_s14, %s485_s13 }
   0x9   : > { %p49_p2 = scmp.eq.s32.totalorder %s501_s16, 0  ;;  %p54_p3 = scmp.ne.s32.totalorder %s485_s13, %s481_s12 }
   0xa   : > { %s660_s19 = smov (%p30_p0, %s29_s19), 0  ;;  %p55_p5 = scmp.eq.s32.totalorder %s313_s17, 0 }
   0xb   : > { %p564_p4 = por %p49_p2, %p48_p1  ;;  %s36_s22 = ssub.s32 %s497_s15, %s660_s19 }
   0xc   : > { %p106_p6 = scmp.eq.s32.totalorder %s313_s17, 1  ;;  %p39_p7 = scmp.eq.s32.totalorder %s36_s22, 0 }
   0xd   : > { %p570_p8 = por %p55_p5, %p54_p3  ;;  %p112_p10 = scmp.eq.s32.totalorder %s314_s18, 1 }
   0xe   : > { %p574_p9 = por %p106_p6, %p48_p1  ;;  %p317_p12 = scmp.ge.s32.totalorder %s501_s16, 2 }
   0xf   : > { %s579_s25 = scalar_select %p39_p7, %s489_s14, %s41_s20  }
  0x10   : > { %p581_p11 = por %p112_p10, %p54_p3  ;;  %p339_p13 = scmp.lt.s32.totalorder %s501_s16, 2 }
  0x11   : > { %s139_s27 = sand.u32 1, %s489_s14   ;;  %s319_s29 = sshll.u32 %s497_s15, 1 }
  0x12   : > { %s318_s28 = sshll.u32 %s139_s27, 1  ;;  %s148_s5 = scalar_lea.hbm %s647_s1, %s319_s29 }
  0x13   : > { %s143_s6 = scalar_lea.vmem [#allocation4], %s318_s28  ;;  %s150_s8 = sshll.u32 %s148_s5, 4  ;;  %s151_s8 = int_to_ptr.hbm [resolvable:$true] %s150_s8 }
  0x14   : > { %s152_s7 = sshll.u32 %s143_s6, 4  ;;  %p332_p0 = pnand %p339_p13, %p564_p4  ;;  %s153_s7 = int_to_ptr.vmem [resolvable:$true] %s152_s7 }
  0x15   : > { %p320_p1 = scmp.ge.s32.totalorder %s501_s16, 1  ;;  %p157_p2 = scmp.lt.s32.totalorder %s501_s16, 3 }
  0x16   : > { %s140_s9 = scalar_lea.sflag [#allocation5], %s139_s27 }
  0x17   : > { %334 = dma.hbm_to_vmem [thread:$0]  (!%p332_p0), %s151_s8, 32, %s153_s7, %s140_s9  }
  0x18   : > { %p158_p3 = pnand %p320_p1, %p157_p2 }
  0x19   : > { %s597_s10 = sand.u32 (!%p158_p3), 1, %s485_s13  }
  0x1a   : > { %161 = sbr.rel (%p158_p3) target bundleno = 47 (0x2f), region = 28  ;;  %s321_s11 = sshll.u32 (!%p158_p3), %s597_s10, 1 }
  0x1b   : > { %s164_s17 = scalar_lea.sflag (!%p158_p3), [#allocation5], %s597_s10  ;;  %s167_s18 = scalar_lea.vmem (!%p158_p3), [#allocation4], %s321_s11 }
  0x1f   : > { %472 = dma.done.wait (%p570_p8), %s164_s17, 32  }
  0x20   : > { %474 = vsyncadd (%p570_p8), %s164_s17, 4294967264  ;;  %s324_s20 = sshll.u32 %s493_s0, 1  ;;  %s192_s28 = scalar_lea.vmem [#allocation7], %s321_s11  ;;  %v197_v0 = vld [vmem:[%s167_s18] sm:$0x3] }
  0x21   : > { %s213_s27 = scalar_lea.hbm %s649_s3, %s324_s20  ;;  %s215_s29 = sshll.u32 %s192_s28, 4  ;;  %v198_v1 = vld [vmem:[%s648_s2] sm:$0x3]  ;;  %s216_s29 = int_to_ptr.vmem [resolvable:$true] %s215_s29 }
  0x22   : > { %s217_s30 = sshll.u32 %s213_s27, 4  ;;  %v199_v2 = vadd.f32 %v198_v1, %v197_v0  ;;  %s202_s23 = scalar_lea.sflag [#allocation6], %s597_s10  ;;  %s218_s30 = int_to_ptr.hbm [resolvable:$true] %s217_s30 }
  0x23   : > { %s433_s6 = sshra.s32 %s218_s30, 4  ;;  %s439_s9 = scalar_lea.hbm %s649_s3, 4  ;;  %s434_s6 = int_to_ptr.hbm [resolvable:$true] %s433_s6 }
  0x24   : > { %200 = vst [vmem:[%s192_s28] sm:$0x3] %v199_v2  ;;  %s435_s0 = scalar_lea.hbm %s434_s6, 2  ;;  %p440_p7 = scmp.lt.s32.totalorder %s434_s6, %s649_s3 }
  0x25   : > { %p436_p4 = scmp.ne.s32.totalorder %s434_s6, %s435_s0  ;;  %p441_p8 = scmp.lt.s32.totalorder %s439_s9, %s435_s0 }
  0x27   : > { %p437_p5 = pnand %p436_p4, %p574_p9  ;;  %p442_p10 = por %p441_p8, %p440_p7 }
  0x29   : > { %p438_p6 = pneg %p437_p5 }
  0x2b   : > { %p443_p13 = pnand %p442_p10, %p438_p6 }
  0x2d   : > { %446 = shalt.err (!%p443_p13)
}
  0x2e   : > { %329 = dma.vmem_to_hbm [thread:$0]  (%p574_p9), %s216_s29, 32, %s218_s30, %s202_s23  }
  0x2f PF: > { %s229_s10 = sand.u32 1, %s481_s12   ;;  %p336_p0 = pnand %p317_p12, %p581_p11 }
  0x30   : > { %s230_s18 = scalar_lea.sflag [#allocation6], %s229_s10 }
  0x31   : > { %p337_p1 = pneg %p336_p0 }
  0x33   : > { %476 = dma.done.wait (%p337_p1), %s230_s18, 32  }
  0x34   : > { %478 = vsyncadd (%p337_p1), %s230_s18, 4294967264  ;;  %s20_s16 = sadd.s32 1, %s501_s16   ;;  %s654_s12 = smov %s485_s13 }
  0x35   : > { %p17_p2 = scmp.ge.s32.totalorder %s20_s16, 4   ;;  %s655_s13 = smov %s489_s14 }
  0x36   : > { %s656_s14 = smov %s579_s25  ;;  %s657_s0 = smov %s497_s15 }
  0x37   : > { %s658_s15 = smov %s660_s19  ;;  %19 = sbr.rel (!%p17_p2) target bundleno = 6 (0x6), region = 76 }
  0x3c   :  { %236 = vsyncpa [#allocation5], 1 }
  0x3d   :  { %238 = vsyncpa [#allocation5 + $0x1], 1 }
  0x3e   :  { %239 = vsyncpa [#allocation6], 1 }
  0x3f   :  { %241 = vsyncpa [#allocation6 + $0x1], 1 }

</bundles_post_ra>
